<compile_context>
chip_gen: v5e
topology: v5e:2x2
jax: 0.10.0
libtpu: 0.0.40
codegen_flags: <defaults>
</compile_context>

<pallas_src>
import jax
import jax.numpy as jnp
from jax.experimental import pallas as pl
from jax.experimental.pallas import tpu as pltpu

# ---- problem sizes (small, deterministic) ----
B = 2            # batch
P = 128          # number of prior tubes (lanes)
K = 2            # k_frames
C = 8            # num_class
KB = K * B       # (frame, batch) pairs packed on sublanes, row = k*B + b
VARIANCE = (0.1, 0.1, 0.2, 0.2)

# feature-plane indices in the (NF, KB, P) slab
F_PXMIN, F_PYMIN, F_PXMAX, F_PYMAX = 0, 1, 2, 3
F_GXMIN, F_GYMIN, F_GXMAX, F_GYMAX = 4, 5, 6, 7
F_AREAS = 8                       # gt_area + prior_area
F_PCX, F_PCY = 9, 10
F_INVW, F_INVH = 11, 12           # 1/(prior_w * v0), 1/(prior_h * v1)
F_PLW, F_PLH = 13, 14             # log(prior_w)/v2, log(prior_h)/v3
F_GCX, F_GCY = 15, 16
F_GLW, F_GLH = 17, 18             # log(gt_w)/v2,    log(gt_h)/v3
NF = 19

OUT_ROWS = 4 + 2 * B              # = 8 -> one dense (8, 128) output tile
NEG_BIG = -1e30


# --------------------------------------------------------------------------
# Fused kernel: IoU + matching + encode/smooth-L1 + conf log-softmax CE +
#               hard-negative mining + all reductions and final divides.
# --------------------------------------------------------------------------
def _fused_cuboid_kernel(gtc_ref, feat_ref, conf_ref, loc_ref, o_ref):
    # ---------------- tube IoU, sublane-vectorized over (k, b) -------------
    ix = (jnp.minimum(feat_ref[F_PXMAX], feat_ref[F_GXMAX])
          - jnp.maximum(feat_ref[F_PXMIN], feat_ref[F_GXMIN]))
    iy = (jnp.minimum(feat_ref[F_PYMAX], feat_ref[F_GYMAX])
          - jnp.maximum(feat_ref[F_PYMIN], feat_ref[F_GYMIN]))
    cross = jnp.maximum(ix, 0.0) * jnp.maximum(iy, 0.0)            # (KB, P)
    ratio = cross / (feat_ref[F_AREAS] - cross)                     # exact divide

    cross_b = cross[0:B, :]
    ratio_b = ratio[0:B, :]
    for k in range(1, K):                                           # static (K=2)
        cross_b = cross_b + cross[k * B:(k + 1) * B, :]
        ratio_b = ratio_b + ratio[k * B:(k + 1) * B, :]
    iou = jnp.where(cross_b > 0.0, ratio_b * (1.0 / K), 0.0)        # (B, P)

    # ---------------- ACTMatchTube: forced argmax + IoU >= 0.5 -------------
    lane = jax.lax.broadcasted_iota(jnp.int32, (B, P), 1).astype(jnp.float32)
    iou_max = jnp.max(iou, axis=1, keepdims=True)                   # (B, 1)
    best = jnp.min(jnp.where(iou == iou_max, lane, float(P)),
                   axis=1, keepdims=True)                           # first argmax
    pos = (iou >= 0.5) | (lane == best)                             # (B, P)
    pos_f = pos.astype(jnp.float32)
    num_pos = jnp.sum(pos_f, axis=1, keepdims=True)                 # (B, 1)
    n_total = jnp.sum(num_pos, axis=0, keepdims=True)               # (1, 1)

    # ---------------- EncodeTube + smooth-L1, vectorized over (k, b) -------
    def huber(d):
        ad = jnp.abs(d)
        return jnp.where(ad < 1.0, 0.5 * d * d, ad - 0.5)

    e0 = (feat_ref[F_GCX] - feat_ref[F_PCX]) * feat_ref[F_INVW]
    e1 = (feat_ref[F_GCY] - feat_ref[F_PCY]) * feat_ref[F_INVH]
    e2 = feat_ref[F_GLW] - feat_ref[F_PLW]
    e3 = feat_ref[F_GLH] - feat_ref[F_PLH]
    h = (huber(loc_ref[0] - e0) + huber(loc_ref[1] - e1)
         + huber(loc_ref[2] - e2) + huber(loc_ref[3] - e3))          # (KB, P)
    loc_b = h[0:B, :]
    for k in range(1, K):
        loc_b = loc_b + h[k * B:(k + 1) * B, :]                      # (B, P)
    loc_total = jnp.sum(jnp.sum(loc_b * pos_f, axis=1, keepdims=True),
                        axis=0, keepdims=True)                       # (1, 1)

    # ---------------- per-prior CE at background / gt class ----------------
    cls_iota = jax.lax.broadcasted_iota(jnp.int32, (C, P), 0)
    ce_rows = []
    for b in range(B):                                               # static (B=2)
        z = conf_ref[b]                                              # (C, P)
        z = z - jnp.max(z, axis=0, keepdims=True)
        lse = jnp.log(jnp.sum(jnp.exp(z), axis=0, keepdims=True))    # (1, P)
        z_gt = jnp.sum(jnp.where(cls_iota == gtc_ref[b], z, 0.0),
                       axis=0, keepdims=True)                        # (1, P)
        z_lab = jnp.where(pos[b:b + 1, :], z_gt, z[0:1, :])
        ce_rows.append(lse - z_lab)                                  # -log p(label)
    ce = jnp.concatenate(ce_rows, axis=0)                            # (B, P)

    # ---------------- ACTMineHardExamples: rank-by-CE (no argsort) ---------
    # TODO(synk): equivalent to the reference sorted early-break loop for
    # distinct loss values; exact ties at the 3*num_pos cutoff may admit a
    # few extra negatives.
    ml = jnp.where(pos, NEG_BIG, ce)                                 # (B, P)
    ml8 = jnp.concatenate(
        [ml, jnp.full((8 - B, P), NEG_BIG, jnp.float32)], axis=0)    # (8, P)
    mlT = jnp.transpose(ml8)                                         # (P, 8), one vxpose
    ones_row = jnp.ones((1, P), jnp.float32)

    ce_total = jnp.zeros((1, 1), jnp.float32)
    sel_total = jnp.zeros((1, 1), jnp.float32)
    for b in range(B):                                               # static (B=2)
        cmp = (mlT[:, b:b + 1] > ml[b:b + 1, :]).astype(jnp.float32)           # (P, P)
        rank = jnp.dot(ones_row, cmp, preferred_element_type=jnp.float32)      # MXU
        neg = (rank < 3.0 * num_pos[b:b + 1, :]) & jnp.logical_not(pos[b:b + 1, :])
        sel_f = (pos[b:b + 1, :] | neg).astype(jnp.float32)
        ce_total = ce_total + jnp.sum(ce[b:b + 1, :] * sel_f, axis=1, keepdims=True)
        sel_total = sel_total + jnp.sum(sel_f, axis=1, keepdims=True)

    # ---------------- final losses (all reductions + divides in-kernel) ----
    loss_l = loc_total * (1.0 / K) / n_total                         # (1, 1)
    loss_c = ce_total / sel_total                                    # (1, 1)

    slab = jnp.concatenate([
        jnp.broadcast_to(loss_l, (1, P)),      # row 0: loss_l
        jnp.broadcast_to(loss_c, (1, P)),      # row 1: loss_c
        jnp.broadcast_to(n_total, (1, P)),     # row 2: N (total positives)
        jnp.broadcast_to(sel_total, (1, P)),   # row 3: total selected
        iou,                                   # rows 4..5: per-prior IoU (diag)
        pos_f,                                 # rows 6..7: positive mask (diag)
    ], axis=0)                                 # (8, P) lane-dense store
    o_ref[...] = slab


# --------------------------------------------------------------------------
# Glue: one-time layout prep (single small fusion) + single pallas_call.
# --------------------------------------------------------------------------
def _build_features(prior_tubes, ground_truth):
    v0, v1, v2, v3 = VARIANCE
    pr = jnp.transpose(prior_tubes.reshape(P, K, 4), (2, 1, 0)).astype(jnp.float32)
    pxmin, pymin, pxmax, pymax = pr[0], pr[1], pr[2], pr[3]          # (K, P)
    pw = pxmax - pxmin
    ph = pymax - pymin

    gt = ground_truth[:, 1:].reshape(B, K, 4).astype(jnp.float32)    # (B, K, 4)
    gxmin, gymin, gxmax, gymax = gt[..., 0], gt[..., 1], gt[..., 2], gt[..., 3]
    gw = gxmax - gxmin
    gh = gymax - gymin

    def p2kb(x):                     # prior plane (K, P) -> (KB, P), row = k*B + b
        return jnp.repeat(x, B, axis=0)

    def g2kb(x):                     # gt scalar (B, K) -> (KB, P), row = k*B + b
        return jnp.broadcast_to(jnp.transpose(x).reshape(KB, 1), (KB, P))

    planes = [None] * NF
    planes[F_PXMIN] = p2kb(pxmin)
    planes[F_PYMIN] = p2kb(pymin)
    planes[F_PXMAX] = p2kb(pxmax)
    planes[F_PYMAX] = p2kb(pymax)
    planes[F_GXMIN] = g2kb(gxmin)
    planes[F_GYMIN] = g2kb(gymin)
    planes[F_GXMAX] = g2kb(gxmax)
    planes[F_GYMAX] = g2kb(gymax)
    planes[F_AREAS] = g2kb(gw * gh) + p2kb(pw * ph)
    planes[F_PCX] = p2kb((pxmin + pxmax) * 0.5)
    planes[F_PCY] = p2kb((pymin + pymax) * 0.5)
    planes[F_INVW] = p2kb(1.0 / (pw * v0))
    planes[F_INVH] = p2kb(1.0 / (ph * v1))
    planes[F_PLW] = p2kb(jnp.log(pw) / v2)
    planes[F_PLH] = p2kb(jnp.log(ph) / v3)
    planes[F_GCX] = g2kb((gxmin + gxmax) * 0.5)
    planes[F_GCY] = g2kb((gymin + gymax) * 0.5)
    planes[F_GLW] = g2kb(jnp.log(gw) / v2)
    planes[F_GLH] = g2kb(jnp.log(gh) / v3)
    return jnp.stack(planes, axis=0)                                 # (NF, KB, P)


def cuboid_loss_forward(loc_preds, conf_preds, ground_truth, prior_tubes):
    feat = _build_features(prior_tubes, ground_truth)                # (NF, KB, P)
    gt_class = ground_truth[:, 0].astype(jnp.int32)                  # (B,)
    conf_t = jnp.transpose(conf_preds, (0, 2, 1)).astype(jnp.float32)          # (B, C, P)
    loc_t = jnp.transpose(loc_preds.reshape(B, P, K, 4),
                          (3, 2, 0, 1)).reshape(4, KB, P).astype(jnp.float32)  # (4, KB, P)

    out = pl.pallas_call(
        _fused_cuboid_kernel,
        out_shape=jax.ShapeDtypeStruct((OUT_ROWS, P), jnp.float32),
        in_specs=[
            pl.BlockSpec(memory_space=pltpu.MemorySpace.SMEM),   # gt class ids
            pl.BlockSpec(memory_space=pltpu.MemorySpace.VMEM),   # feature slab
            pl.BlockSpec(memory_space=pltpu.MemorySpace.VMEM),   # conf (B,C,P)
            pl.BlockSpec(memory_space=pltpu.MemorySpace.VMEM),   # loc  (4,KB,P)
        ],
        out_specs=pl.BlockSpec(memory_space=pltpu.MemorySpace.VMEM),
        compiler_params=pltpu.CompilerParams(
            allow_input_fusion=[False, True, True, True]),
    )(gt_class, feat, conf_t, loc_t)

    return out[0, 0], out[1, 0]


# --------------------------------------------------------------------------
# Deterministic parameter / input construction + run
# --------------------------------------------------------------------------
def build_prior_tubes():
    # deterministic grid of prior boxes, 16 x 8 centers, 0.25 x 0.25 boxes,
    # slightly shifted per frame. Shape (P, 4*K).
    idx = jnp.arange(P)
    cx = ((idx % 16).astype(jnp.float32) + 0.5) / 16.0
    cy = ((idx // 16).astype(jnp.float32) + 0.5) / 8.0
    cols = []
    for k in range(K):
        s = 0.01 * k
        cols += [cx - 0.125 + s, cy - 0.125 + s, cx + 0.125 + s, cy + 0.125 + s]
    return jnp.stack(cols, axis=1).astype(jnp.float32)               # (P, 4K)


if __name__ == "__main__":
    key = jax.random.PRNGKey(0)
    k1, k2 = jax.random.split(key)

    prior_tubes = build_prior_tubes()                                # (128, 8)

    # ground_truth[i] = [class, (xmin, ymin, xmax, ymax) * K]
    ground_truth = jnp.array(
        [[1.0, 0.05, 0.10, 0.35, 0.40, 0.06, 0.11, 0.36, 0.41],
         [3.0, 0.50, 0.45, 0.85, 0.80, 0.51, 0.46, 0.86, 0.81]],
        dtype=jnp.float32)                                           # (2, 9)

    loc_preds = 0.1 * jax.random.normal(k1, (B, P, 4 * K), dtype=jnp.float32)
    conf_preds = jax.random.normal(k2, (B, P, C), dtype=jnp.float32)

    loss_l, loss_c = jax.jit(cuboid_loss_forward)(
        loc_preds, conf_preds, ground_truth, prior_tubes)
    jax.block_until_ready((loss_l, loss_c))

    # TODO(synk): the original forward's inf/nan pickle-dump-and-exit branch is
    # replaced by this finiteness assert.
    assert bool(jnp.isfinite(loss_l)) and bool(jnp.isfinite(loss_c))
    print("KERNEL_OK")
</pallas_src>

<mosaic_0001>
module attributes {stable_mosaic.version = 11 : i64} {
  func.func @_fused_cuboid_kernel(%arg0: memref<2xi32, #tpu.memory_space<smem>>, %arg1: memref<19x4x128xf32, #tpu.memory_space<vmem>>, %arg2: memref<2x8x128xf32, #tpu.memory_space<vmem>>, %arg3: memref<4x4x128xf32, #tpu.memory_space<vmem>>, %arg4: memref<8x128xf32, #tpu.memory_space<vmem>>) attributes {dimension_semantics = [], scalar_prefetch = 0 : i64, scratch_operands = 0 : i64, tpu.core_type = #tpu.core_type<tc>} {
    %c2 = arith.constant 2 : index
    %c0 = arith.constant 0 : index
    %c0_0 = arith.constant 0 : index
    %0 = vector.load %arg1[%c2, %c0, %c0_0] : memref<19x4x128xf32, #tpu.memory_space<vmem>>, vector<1x4x128xf32>
    %1 = vector.shape_cast %0 : vector<1x4x128xf32> to vector<4x128xf32>
    %c6 = arith.constant 6 : index
    %c0_1 = arith.constant 0 : index
    %c0_2 = arith.constant 0 : index
    %2 = vector.load %arg1[%c6, %c0_1, %c0_2] : memref<19x4x128xf32, #tpu.memory_space<vmem>>, vector<1x4x128xf32>
    %3 = vector.shape_cast %2 : vector<1x4x128xf32> to vector<4x128xf32>
    %4 = arith.minimumf %1, %3 : vector<4x128xf32>
    %c0_3 = arith.constant 0 : index
    %c0_4 = arith.constant 0 : index
    %c0_5 = arith.constant 0 : index
    %5 = vector.load %arg1[%c0_3, %c0_4, %c0_5] : memref<19x4x128xf32, #tpu.memory_space<vmem>>, vector<1x4x128xf32>
    %6 = vector.shape_cast %5 : vector<1x4x128xf32> to vector<4x128xf32>
    %c4 = arith.constant 4 : index
    %c0_6 = arith.constant 0 : index
    %c0_7 = arith.constant 0 : index
    %7 = vector.load %arg1[%c4, %c0_6, %c0_7] : memref<19x4x128xf32, #tpu.memory_space<vmem>>, vector<1x4x128xf32>
    %8 = vector.shape_cast %7 : vector<1x4x128xf32> to vector<4x128xf32>
    %9 = arith.maximumf %6, %8 : vector<4x128xf32>
    %10 = arith.subf %4, %9 : vector<4x128xf32>
    %c3 = arith.constant 3 : index
    %c0_8 = arith.constant 0 : index
    %c0_9 = arith.constant 0 : index
    %11 = vector.load %arg1[%c3, %c0_8, %c0_9] : memref<19x4x128xf32, #tpu.memory_space<vmem>>, vector<1x4x128xf32>
    %12 = vector.shape_cast %11 : vector<1x4x128xf32> to vector<4x128xf32>
    %c7 = arith.constant 7 : index
    %c0_10 = arith.constant 0 : index
    %c0_11 = arith.constant 0 : index
    %13 = vector.load %arg1[%c7, %c0_10, %c0_11] : memref<19x4x128xf32, #tpu.memory_space<vmem>>, vector<1x4x128xf32>
    %14 = vector.shape_cast %13 : vector<1x4x128xf32> to vector<4x128xf32>
    %15 = arith.minimumf %12, %14 : vector<4x128xf32>
    %c1 = arith.constant 1 : index
    %c0_12 = arith.constant 0 : index
    %c0_13 = arith.constant 0 : index
    %16 = vector.load %arg1[%c1, %c0_12, %c0_13] : memref<19x4x128xf32, #tpu.memory_space<vmem>>, vector<1x4x128xf32>
    %17 = vector.shape_cast %16 : vector<1x4x128xf32> to vector<4x128xf32>
    %c5 = arith.constant 5 : index
    %c0_14 = arith.constant 0 : index
    %c0_15 = arith.constant 0 : index
    %18 = vector.load %arg1[%c5, %c0_14, %c0_15] : memref<19x4x128xf32, #tpu.memory_space<vmem>>, vector<1x4x128xf32>
    %19 = vector.shape_cast %18 : vector<1x4x128xf32> to vector<4x128xf32>
    %20 = arith.maximumf %17, %19 : vector<4x128xf32>
    %21 = arith.subf %15, %20 : vector<4x128xf32>
    %cst = arith.constant 0.000000e+00 : f32
    %22 = vector.broadcast %cst : f32 to vector<4x128xf32>
    %23 = arith.maximumf %10, %22 : vector<4x128xf32>
    %cst_16 = arith.constant 0.000000e+00 : f32
    %24 = vector.broadcast %cst_16 : f32 to vector<4x128xf32>
    %25 = arith.maximumf %21, %24 : vector<4x128xf32>
    %26 = arith.mulf %23, %25 : vector<4x128xf32>
    %c8 = arith.constant 8 : index
    %c0_17 = arith.constant 0 : index
    %c0_18 = arith.constant 0 : index
    %27 = vector.load %arg1[%c8, %c0_17, %c0_18] : memref<19x4x128xf32, #tpu.memory_space<vmem>>, vector<1x4x128xf32>
    %28 = vector.shape_cast %27 : vector<1x4x128xf32> to vector<4x128xf32>
    %29 = arith.subf %28, %26 : vector<4x128xf32>
    %30 = arith.divf %26, %29 : vector<4x128xf32>
    %31 = vector.extract_strided_slice %26 {offsets = [0, 0], sizes = [2, 128], strides = [1, 1]} : vector<4x128xf32> to vector<2x128xf32>
    %32 = vector.extract_strided_slice %30 {offsets = [0, 0], sizes = [2, 128], strides = [1, 1]} : vector<4x128xf32> to vector<2x128xf32>
    %33 = vector.extract_strided_slice %26 {offsets = [2, 0], sizes = [2, 128], strides = [1, 1]} : vector<4x128xf32> to vector<2x128xf32>
    %34 = arith.addf %31, %33 : vector<2x128xf32>
    %35 = vector.extract_strided_slice %30 {offsets = [2, 0], sizes = [2, 128], strides = [1, 1]} : vector<4x128xf32> to vector<2x128xf32>
    %36 = arith.addf %32, %35 : vector<2x128xf32>
    %cst_19 = arith.constant 0.000000e+00 : f32
    %37 = vector.broadcast %cst_19 : f32 to vector<2x128xf32>
    %38 = arith.cmpf ogt, %34, %37 : vector<2x128xf32>
    %cst_20 = arith.constant 5.000000e-01 : f32
    %39 = vector.broadcast %cst_20 : f32 to vector<2x128xf32>
    %40 = arith.mulf %36, %39 : vector<2x128xf32>
    %cst_21 = arith.constant 0.000000e+00 : f32
    %41 = vector.broadcast %cst_21 : f32 to vector<2x128xf32>
    %42 = arith.select %38, %40, %41 : vector<2x128xi1>, vector<2x128xf32>
    %43 = tpu.iota {dimensions = array<i32: 1>} : vector<2x128xi32>
    %44 = arith.sitofp %43 : vector<2x128xi32> to vector<2x128xf32>
    %cst_22 = arith.constant dense<0xFF800000> : vector<2xf32>
    %45 = vector.multi_reduction <maximumf>, %42, %cst_22 [1] : vector<2x128xf32> to vector<2xf32>
    %46 = vector.shape_cast %45 : vector<2xf32> to vector<2x1xf32>
    %47 = vector.broadcast %46 : vector<2x1xf32> to vector<2x128xf32>
    %48 = arith.cmpf oeq, %42, %47 : vector<2x128xf32>
    %cst_23 = arith.constant 1.280000e+02 : f32
    %49 = vector.broadcast %cst_23 : f32 to vector<2x128xf32>
    %50 = arith.select %48, %44, %49 : vector<2x128xi1>, vector<2x128xf32>
    %cst_24 = arith.constant dense<0x7F800000> : vector<2xf32>
    %51 = vector.multi_reduction <minimumf>, %50, %cst_24 [1] : vector<2x128xf32> to vector<2xf32>
    %52 = vector.shape_cast %51 : vector<2xf32> to vector<2x1xf32>
    %cst_25 = arith.constant 5.000000e-01 : f32
    %53 = vector.broadcast %cst_25 : f32 to vector<2x128xf32>
    %54 = arith.cmpf oge, %42, %53 : vector<2x128xf32>
    %55 = vector.broadcast %52 : vector<2x1xf32> to vector<2x128xf32>
    %56 = arith.cmpf oeq, %44, %55 : vector<2x128xf32>
    %57 = arith.ori %54, %56 : vector<2x128xi1>
    %58 = arith.extui %57 : vector<2x128xi1> to vector<2x128xi32>
    %59 = arith.sitofp %58 : vector<2x128xi32> to vector<2x128xf32>
    %cst_26 = arith.constant dense<0.000000e+00> : vector<2xf32>
    %60 = vector.multi_reduction <add>, %59, %cst_26 [1] : vector<2x128xf32> to vector<2xf32>
    %61 = vector.shape_cast %60 : vector<2xf32> to vector<2x1xf32>
    %cst_27 = arith.constant dense<0.000000e+00> : vector<1xf32>
    %62 = vector.multi_reduction <add>, %61, %cst_27 [0] : vector<2x1xf32> to vector<1xf32>
    %63 = vector.shape_cast %62 : vector<1xf32> to vector<1x1xf32>
    %c15 = arith.constant 15 : index
    %c0_28 = arith.constant 0 : index
    %c0_29 = arith.constant 0 : index
    %64 = vector.load %arg1[%c15, %c0_28, %c0_29] : memref<19x4x128xf32, #tpu.memory_space<vmem>>, vector<1x4x128xf32>
    %65 = vector.shape_cast %64 : vector<1x4x128xf32> to vector<4x128xf32>
    %c9 = arith.constant 9 : index
    %c0_30 = arith.constant 0 : index
    %c0_31 = arith.constant 0 : index
    %66 = vector.load %arg1[%c9, %c0_30, %c0_31] : memref<19x4x128xf32, #tpu.memory_space<vmem>>, vector<1x4x128xf32>
    %67 = vector.shape_cast %66 : vector<1x4x128xf32> to vector<4x128xf32>
    %68 = arith.subf %65, %67 : vector<4x128xf32>
    %c11 = arith.constant 11 : index
    %c0_32 = arith.constant 0 : index
    %c0_33 = arith.constant 0 : index
    %69 = vector.load %arg1[%c11, %c0_32, %c0_33] : memref<19x4x128xf32, #tpu.memory_space<vmem>>, vector<1x4x128xf32>
    %70 = vector.shape_cast %69 : vector<1x4x128xf32> to vector<4x128xf32>
    %71 = arith.mulf %68, %70 : vector<4x128xf32>
    %c16 = arith.constant 16 : index
    %c0_34 = arith.constant 0 : index
    %c0_35 = arith.constant 0 : index
    %72 = vector.load %arg1[%c16, %c0_34, %c0_35] : memref<19x4x128xf32, #tpu.memory_space<vmem>>, vector<1x4x128xf32>
    %73 = vector.shape_cast %72 : vector<1x4x128xf32> to vector<4x128xf32>
    %c10 = arith.constant 10 : index
    %c0_36 = arith.constant 0 : index
    %c0_37 = arith.constant 0 : index
    %74 = vector.load %arg1[%c10, %c0_36, %c0_37] : memref<19x4x128xf32, #tpu.memory_space<vmem>>, vector<1x4x128xf32>
    %75 = vector.shape_cast %74 : vector<1x4x128xf32> to vector<4x128xf32>
    %76 = arith.subf %73, %75 : vector<4x128xf32>
    %c12 = arith.constant 12 : index
    %c0_38 = arith.constant 0 : index
    %c0_39 = arith.constant 0 : index
    %77 = vector.load %arg1[%c12, %c0_38, %c0_39] : memref<19x4x128xf32, #tpu.memory_space<vmem>>, vector<1x4x128xf32>
    %78 = vector.shape_cast %77 : vector<1x4x128xf32> to vector<4x128xf32>
    %79 = arith.mulf %76, %78 : vector<4x128xf32>
    %c17 = arith.constant 17 : index
    %c0_40 = arith.constant 0 : index
    %c0_41 = arith.constant 0 : index
    %80 = vector.load %arg1[%c17, %c0_40, %c0_41] : memref<19x4x128xf32, #tpu.memory_space<vmem>>, vector<1x4x128xf32>
    %81 = vector.shape_cast %80 : vector<1x4x128xf32> to vector<4x128xf32>
    %c13 = arith.constant 13 : index
    %c0_42 = arith.constant 0 : index
    %c0_43 = arith.constant 0 : index
    %82 = vector.load %arg1[%c13, %c0_42, %c0_43] : memref<19x4x128xf32, #tpu.memory_space<vmem>>, vector<1x4x128xf32>
    %83 = vector.shape_cast %82 : vector<1x4x128xf32> to vector<4x128xf32>
    %84 = arith.subf %81, %83 : vector<4x128xf32>
    %c18 = arith.constant 18 : index
    %c0_44 = arith.constant 0 : index
    %c0_45 = arith.constant 0 : index
    %85 = vector.load %arg1[%c18, %c0_44, %c0_45] : memref<19x4x128xf32, #tpu.memory_space<vmem>>, vector<1x4x128xf32>
    %86 = vector.shape_cast %85 : vector<1x4x128xf32> to vector<4x128xf32>
    %c14 = arith.constant 14 : index
    %c0_46 = arith.constant 0 : index
    %c0_47 = arith.constant 0 : index
    %87 = vector.load %arg1[%c14, %c0_46, %c0_47] : memref<19x4x128xf32, #tpu.memory_space<vmem>>, vector<1x4x128xf32>
    %88 = vector.shape_cast %87 : vector<1x4x128xf32> to vector<4x128xf32>
    %89 = arith.subf %86, %88 : vector<4x128xf32>
    %c0_48 = arith.constant 0 : index
    %c0_49 = arith.constant 0 : index
    %c0_50 = arith.constant 0 : index
    %90 = vector.load %arg3[%c0_48, %c0_49, %c0_50] : memref<4x4x128xf32, #tpu.memory_space<vmem>>, vector<1x4x128xf32>
    %91 = vector.shape_cast %90 : vector<1x4x128xf32> to vector<4x128xf32>
    %92 = arith.subf %91, %71 : vector<4x128xf32>
    %93 = math.absf %92 : vector<4x128xf32>
    %cst_51 = arith.constant 1.000000e+00 : f32
    %94 = vector.broadcast %cst_51 : f32 to vector<4x128xf32>
    %95 = arith.cmpf olt, %93, %94 : vector<4x128xf32>
    %cst_52 = arith.constant 5.000000e-01 : f32
    %96 = vector.broadcast %cst_52 : f32 to vector<4x128xf32>
    %97 = arith.mulf %96, %92 : vector<4x128xf32>
    %98 = arith.mulf %97, %92 : vector<4x128xf32>
    %cst_53 = arith.constant 5.000000e-01 : f32
    %99 = vector.broadcast %cst_53 : f32 to vector<4x128xf32>
    %100 = arith.subf %93, %99 : vector<4x128xf32>
    %101 = arith.select %95, %98, %100 : vector<4x128xi1>, vector<4x128xf32>
    %c1_54 = arith.constant 1 : index
    %c0_55 = arith.constant 0 : index
    %c0_56 = arith.constant 0 : index
    %102 = vector.load %arg3[%c1_54, %c0_55, %c0_56] : memref<4x4x128xf32, #tpu.memory_space<vmem>>, vector<1x4x128xf32>
    %103 = vector.shape_cast %102 : vector<1x4x128xf32> to vector<4x128xf32>
    %104 = arith.subf %103, %79 : vector<4x128xf32>
    %105 = math.absf %104 : vector<4x128xf32>
    %cst_57 = arith.constant 1.000000e+00 : f32
    %106 = vector.broadcast %cst_57 : f32 to vector<4x128xf32>
    %107 = arith.cmpf olt, %105, %106 : vector<4x128xf32>
    %cst_58 = arith.constant 5.000000e-01 : f32
    %108 = vector.broadcast %cst_58 : f32 to vector<4x128xf32>
    %109 = arith.mulf %108, %104 : vector<4x128xf32>
    %110 = arith.mulf %109, %104 : vector<4x128xf32>
    %cst_59 = arith.constant 5.000000e-01 : f32
    %111 = vector.broadcast %cst_59 : f32 to vector<4x128xf32>
    %112 = arith.subf %105, %111 : vector<4x128xf32>
    %113 = arith.select %107, %110, %112 : vector<4x128xi1>, vector<4x128xf32>
    %114 = arith.addf %101, %113 : vector<4x128xf32>
    %c2_60 = arith.constant 2 : index
    %c0_61 = arith.constant 0 : index
    %c0_62 = arith.constant 0 : index
    %115 = vector.load %arg3[%c2_60, %c0_61, %c0_62] : memref<4x4x128xf32, #tpu.memory_space<vmem>>, vector<1x4x128xf32>
    %116 = vector.shape_cast %115 : vector<1x4x128xf32> to vector<4x128xf32>
    %117 = arith.subf %116, %84 : vector<4x128xf32>
    %118 = math.absf %117 : vector<4x128xf32>
    %cst_63 = arith.constant 1.000000e+00 : f32
    %119 = vector.broadcast %cst_63 : f32 to vector<4x128xf32>
    %120 = arith.cmpf olt, %118, %119 : vector<4x128xf32>
    %cst_64 = arith.constant 5.000000e-01 : f32
    %121 = vector.broadcast %cst_64 : f32 to vector<4x128xf32>
    %122 = arith.mulf %121, %117 : vector<4x128xf32>
    %123 = arith.mulf %122, %117 : vector<4x128xf32>
    %cst_65 = arith.constant 5.000000e-01 : f32
    %124 = vector.broadcast %cst_65 : f32 to vector<4x128xf32>
    %125 = arith.subf %118, %124 : vector<4x128xf32>
    %126 = arith.select %120, %123, %125 : vector<4x128xi1>, vector<4x128xf32>
    %127 = arith.addf %114, %126 : vector<4x128xf32>
    %c3_66 = arith.constant 3 : index
    %c0_67 = arith.constant 0 : index
    %c0_68 = arith.constant 0 : index
    %128 = vector.load %arg3[%c3_66, %c0_67, %c0_68] : memref<4x4x128xf32, #tpu.memory_space<vmem>>, vector<1x4x128xf32>
    %129 = vector.shape_cast %128 : vector<1x4x128xf32> to vector<4x128xf32>
    %130 = arith.subf %129, %89 : vector<4x128xf32>
    %131 = math.absf %130 : vector<4x128xf32>
    %cst_69 = arith.constant 1.000000e+00 : f32
    %132 = vector.broadcast %cst_69 : f32 to vector<4x128xf32>
    %133 = arith.cmpf olt, %131, %132 : vector<4x128xf32>
    %cst_70 = arith.constant 5.000000e-01 : f32
    %134 = vector.broadcast %cst_70 : f32 to vector<4x128xf32>
    %135 = arith.mulf %134, %130 : vector<4x128xf32>
    %136 = arith.mulf %135, %130 : vector<4x128xf32>
    %cst_71 = arith.constant 5.000000e-01 : f32
    %137 = vector.broadcast %cst_71 : f32 to vector<4x128xf32>
    %138 = arith.subf %131, %137 : vector<4x128xf32>
    %139 = arith.select %133, %136, %138 : vector<4x128xi1>, vector<4x128xf32>
    %140 = arith.addf %127, %139 : vector<4x128xf32>
    %141 = vector.extract_strided_slice %140 {offsets = [0, 0], sizes = [2, 128], strides = [1, 1]} : vector<4x128xf32> to vector<2x128xf32>
    %142 = vector.extract_strided_slice %140 {offsets = [2, 0], sizes = [2, 128], strides = [1, 1]} : vector<4x128xf32> to vector<2x128xf32>
    %143 = arith.addf %141, %142 : vector<2x128xf32>
    %144 = arith.mulf %143, %59 : vector<2x128xf32>
    %cst_72 = arith.constant dense<0.000000e+00> : vector<2xf32>
    %145 = vector.multi_reduction <add>, %144, %cst_72 [1] : vector<2x128xf32> to vector<2xf32>
    %146 = vector.shape_cast %145 : vector<2xf32> to vector<2x1xf32>
    %cst_73 = arith.constant dense<0.000000e+00> : vector<1xf32>
    %147 = vector.multi_reduction <add>, %146, %cst_73 [0] : vector<2x1xf32> to vector<1xf32>
    %148 = vector.shape_cast %147 : vector<1xf32> to vector<1x1xf32>
    %149 = tpu.iota {dimensions = array<i32: 0>} : vector<8x128xi32>
    %c0_74 = arith.constant 0 : index
    %c0_75 = arith.constant 0 : index
    %c0_76 = arith.constant 0 : index
    %150 = vector.load %arg2[%c0_74, %c0_75, %c0_76] : memref<2x8x128xf32, #tpu.memory_space<vmem>>, vector<1x8x128xf32>
    %151 = vector.shape_cast %150 : vector<1x8x128xf32> to vector<8x128xf32>
    %cst_77 = arith.constant dense<0xFF800000> : vector<128xf32>
    %152 = vector.multi_reduction <maximumf>, %151, %cst_77 [0] : vector<8x128xf32> to vector<128xf32>
    %153 = vector.shape_cast %152 : vector<128xf32> to vector<1x128xf32>
    %154 = vector.broadcast %153 : vector<1x128xf32> to vector<8x128xf32>
    %155 = arith.subf %151, %154 : vector<8x128xf32>
    %156 = math.exp %155 : vector<8x128xf32>
    %cst_78 = arith.constant dense<0.000000e+00> : vector<128xf32>
    %157 = vector.multi_reduction <add>, %156, %cst_78 [0] : vector<8x128xf32> to vector<128xf32>
    %158 = vector.shape_cast %157 : vector<128xf32> to vector<1x128xf32>
    %159 = math.log %158 : vector<1x128xf32>
    %c0_79 = arith.constant 0 : index
    %160 = memref.load %arg0[%c0_79] : memref<2xi32, #tpu.memory_space<smem>>
    %161 = vector.broadcast %160 : i32 to vector<8x128xi32>
    %162 = arith.cmpi eq, %149, %161 : vector<8x128xi32>
    %cst_80 = arith.constant 0.000000e+00 : f32
    %163 = vector.broadcast %cst_80 : f32 to vector<8x128xf32>
    %164 = arith.select %162, %155, %163 : vector<8x128xi1>, vector<8x128xf32>
    %cst_81 = arith.constant dense<0.000000e+00> : vector<128xf32>
    %165 = vector.multi_reduction <add>, %164, %cst_81 [0] : vector<8x128xf32> to vector<128xf32>
    %166 = vector.shape_cast %165 : vector<128xf32> to vector<1x128xf32>
    %167 = vector.extract_strided_slice %57 {offsets = [0, 0], sizes = [1, 128], strides = [1, 1]} : vector<2x128xi1> to vector<1x128xi1>
    %168 = vector.extract_strided_slice %155 {offsets = [0, 0], sizes = [1, 128], strides = [1, 1]} : vector<8x128xf32> to vector<1x128xf32>
    %169 = arith.select %167, %166, %168 : vector<1x128xi1>, vector<1x128xf32>
    %170 = arith.subf %159, %169 : vector<1x128xf32>
    %c1_82 = arith.constant 1 : index
    %c0_83 = arith.constant 0 : index
    %c0_84 = arith.constant 0 : index
    %171 = vector.load %arg2[%c1_82, %c0_83, %c0_84] : memref<2x8x128xf32, #tpu.memory_space<vmem>>, vector<1x8x128xf32>
    %172 = vector.shape_cast %171 : vector<1x8x128xf32> to vector<8x128xf32>
    %cst_85 = arith.constant dense<0xFF800000> : vector<128xf32>
    %173 = vector.multi_reduction <maximumf>, %172, %cst_85 [0] : vector<8x128xf32> to vector<128xf32>
    %174 = vector.shape_cast %173 : vector<128xf32> to vector<1x128xf32>
    %175 = vector.broadcast %174 : vector<1x128xf32> to vector<8x128xf32>
    %176 = arith.subf %172, %175 : vector<8x128xf32>
    %177 = math.exp %176 : vector<8x128xf32>
    %cst_86 = arith.constant dense<0.000000e+00> : vector<128xf32>
    %178 = vector.multi_reduction <add>, %177, %cst_86 [0] : vector<8x128xf32> to vector<128xf32>
    %179 = vector.shape_cast %178 : vector<128xf32> to vector<1x128xf32>
    %180 = math.log %179 : vector<1x128xf32>
    %c1_87 = arith.constant 1 : index
    %181 = memref.load %arg0[%c1_87] : memref<2xi32, #tpu.memory_space<smem>>
    %182 = vector.broadcast %181 : i32 to vector<8x128xi32>
    %183 = arith.cmpi eq, %149, %182 : vector<8x128xi32>
    %cst_88 = arith.constant 0.000000e+00 : f32
    %184 = vector.broadcast %cst_88 : f32 to vector<8x128xf32>
    %185 = arith.select %183, %176, %184 : vector<8x128xi1>, vector<8x128xf32>
    %cst_89 = arith.constant dense<0.000000e+00> : vector<128xf32>
    %186 = vector.multi_reduction <add>, %185, %cst_89 [0] : vector<8x128xf32> to vector<128xf32>
    %187 = vector.shape_cast %186 : vector<128xf32> to vector<1x128xf32>
    %188 = vector.extract_strided_slice %57 {offsets = [1, 0], sizes = [1, 128], strides = [1, 1]} : vector<2x128xi1> to vector<1x128xi1>
    %189 = vector.extract_strided_slice %176 {offsets = [0, 0], sizes = [1, 128], strides = [1, 1]} : vector<8x128xf32> to vector<1x128xf32>
    %190 = arith.select %188, %187, %189 : vector<1x128xi1>, vector<1x128xf32>
    %191 = arith.subf %180, %190 : vector<1x128xf32>
    %192 = tpu.concatenate %170, %191 in 0 : vector<1x128xf32>, vector<1x128xf32> -> vector<2x128xf32>
    %cst_90 = arith.constant -1.000000e+30 : f32
    %193 = vector.broadcast %cst_90 : f32 to vector<2x128xf32>
    %194 = arith.select %57, %193, %192 : vector<2x128xi1>, vector<2x128xf32>
    %cst_91 = arith.constant -1.000000e+30 : f32
    %195 = vector.broadcast %cst_91 : f32 to vector<6x128xf32>
    %196 = tpu.concatenate %194, %195 in 0 : vector<2x128xf32>, vector<6x128xf32> -> vector<8x128xf32>
    %197 = tpu.transpose %196, [1, 0] : vector<8x128xf32> -> vector<128x8xf32>
    %cst_92 = arith.constant 1.000000e+00 : f32
    %198 = vector.broadcast %cst_92 : f32 to vector<1x128xf32>
    %cst_93 = arith.constant 0.000000e+00 : f32
    %199 = vector.broadcast %cst_93 : f32 to vector<1x1xf32>
    %cst_94 = arith.constant 0.000000e+00 : f32
    %200 = vector.broadcast %cst_94 : f32 to vector<1x1xf32>
    %201 = vector.extract_strided_slice %197 {offsets = [0, 0], sizes = [128, 1], strides = [1, 1]} : vector<128x8xf32> to vector<128x1xf32>
    %202 = vector.extract_strided_slice %194 {offsets = [0, 0], sizes = [1, 128], strides = [1, 1]} : vector<2x128xf32> to vector<1x128xf32>
    %203 = vector.broadcast %201 : vector<128x1xf32> to vector<128x128xf32>
    %204 = vector.broadcast %202 : vector<1x128xf32> to vector<128x128xf32>
    %205 = arith.cmpf ogt, %203, %204 : vector<128x128xf32>
    %206 = arith.extui %205 : vector<128x128xi1> to vector<128x128xi32>
    %207 = arith.sitofp %206 : vector<128x128xi32> to vector<128x128xf32>
    %cst_95 = arith.constant dense<0.000000e+00> : vector<1x128xf32>
    %208 = tpu.matmul %198, %207, %cst_95 {dimension_numbers = #tpu.dot_dimension_numbers<[1], [0], [0], [1], [0, 0, 1, 1], [], []>} : vector<1x128xf32>, vector<128x128xf32>, vector<1x128xf32> -> vector<1x128xf32>
    %209 = vector.extract_strided_slice %61 {offsets = [0, 0], sizes = [1, 1], strides = [1, 1]} : vector<2x1xf32> to vector<1x1xf32>
    %cst_96 = arith.constant 3.000000e+00 : f32
    %210 = vector.broadcast %cst_96 : f32 to vector<1x1xf32>
    %211 = arith.mulf %210, %209 : vector<1x1xf32>
    %212 = vector.broadcast %211 : vector<1x1xf32> to vector<1x128xf32>
    %213 = arith.cmpf olt, %208, %212 : vector<1x128xf32>
    %214 = vector.extract_strided_slice %57 {offsets = [0, 0], sizes = [1, 128], strides = [1, 1]} : vector<2x128xi1> to vector<1x128xi1>
    %cst_97 = arith.constant dense<true> : vector<1x128xi1>
    %215 = arith.xori %214, %cst_97 : vector<1x128xi1>
    %216 = arith.andi %213, %215 : vector<1x128xi1>
    %217 = vector.extract_strided_slice %57 {offsets = [0, 0], sizes = [1, 128], strides = [1, 1]} : vector<2x128xi1> to vector<1x128xi1>
    %218 = arith.ori %217, %216 : vector<1x128xi1>
    %219 = arith.extui %218 : vector<1x128xi1> to vector<1x128xi32>
    %220 = arith.sitofp %219 : vector<1x128xi32> to vector<1x128xf32>
    %221 = vector.extract_strided_slice %192 {offsets = [0, 0], sizes = [1, 128], strides = [1, 1]} : vector<2x128xf32> to vector<1x128xf32>
    %222 = arith.mulf %221, %220 : vector<1x128xf32>
    %cst_98 = arith.constant dense<0.000000e+00> : vector<1xf32>
    %223 = vector.multi_reduction <add>, %222, %cst_98 [1] : vector<1x128xf32> to vector<1xf32>
    %224 = vector.shape_cast %223 : vector<1xf32> to vector<1x1xf32>
    %225 = arith.addf %199, %224 : vector<1x1xf32>
    %cst_99 = arith.constant dense<0.000000e+00> : vector<1xf32>
    %226 = vector.multi_reduction <add>, %220, %cst_99 [1] : vector<1x128xf32> to vector<1xf32>
    %227 = vector.shape_cast %226 : vector<1xf32> to vector<1x1xf32>
    %228 = arith.addf %200, %227 : vector<1x1xf32>
    %229 = vector.extract_strided_slice %197 {offsets = [0, 1], sizes = [128, 1], strides = [1, 1]} : vector<128x8xf32> to vector<128x1xf32>
    %230 = vector.extract_strided_slice %194 {offsets = [1, 0], sizes = [1, 128], strides = [1, 1]} : vector<2x128xf32> to vector<1x128xf32>
    %231 = vector.broadcast %229 : vector<128x1xf32> to vector<128x128xf32>
    %232 = vector.broadcast %230 : vector<1x128xf32> to vector<128x128xf32>
    %233 = arith.cmpf ogt, %231, %232 : vector<128x128xf32>
    %234 = arith.extui %233 : vector<128x128xi1> to vector<128x128xi32>
    %235 = arith.sitofp %234 : vector<128x128xi32> to vector<128x128xf32>
    %cst_100 = arith.constant dense<0.000000e+00> : vector<1x128xf32>
    %236 = tpu.matmul %198, %235, %cst_100 {dimension_numbers = #tpu.dot_dimension_numbers<[1], [0], [0], [1], [0, 0, 1, 1], [], []>} : vector<1x128xf32>, vector<128x128xf32>, vector<1x128xf32> -> vector<1x128xf32>
    %237 = vector.extract_strided_slice %61 {offsets = [1, 0], sizes = [1, 1], strides = [1, 1]} : vector<2x1xf32> to vector<1x1xf32>
    %cst_101 = arith.constant 3.000000e+00 : f32
    %238 = vector.broadcast %cst_101 : f32 to vector<1x1xf32>
    %239 = arith.mulf %238, %237 : vector<1x1xf32>
    %240 = vector.broadcast %239 : vector<1x1xf32> to vector<1x128xf32>
    %241 = arith.cmpf olt, %236, %240 : vector<1x128xf32>
    %242 = vector.extract_strided_slice %57 {offsets = [1, 0], sizes = [1, 128], strides = [1, 1]} : vector<2x128xi1> to vector<1x128xi1>
    %cst_102 = arith.constant dense<true> : vector<1x128xi1>
    %243 = arith.xori %242, %cst_102 : vector<1x128xi1>
    %244 = arith.andi %241, %243 : vector<1x128xi1>
    %245 = vector.extract_strided_slice %57 {offsets = [1, 0], sizes = [1, 128], strides = [1, 1]} : vector<2x128xi1> to vector<1x128xi1>
    %246 = arith.ori %245, %244 : vector<1x128xi1>
    %247 = arith.extui %246 : vector<1x128xi1> to vector<1x128xi32>
    %248 = arith.sitofp %247 : vector<1x128xi32> to vector<1x128xf32>
    %249 = vector.extract_strided_slice %192 {offsets = [1, 0], sizes = [1, 128], strides = [1, 1]} : vector<2x128xf32> to vector<1x128xf32>
    %250 = arith.mulf %249, %248 : vector<1x128xf32>
    %cst_103 = arith.constant dense<0.000000e+00> : vector<1xf32>
    %251 = vector.multi_reduction <add>, %250, %cst_103 [1] : vector<1x128xf32> to vector<1xf32>
    %252 = vector.shape_cast %251 : vector<1xf32> to vector<1x1xf32>
    %253 = arith.addf %225, %252 : vector<1x1xf32>
    %cst_104 = arith.constant dense<0.000000e+00> : vector<1xf32>
    %254 = vector.multi_reduction <add>, %248, %cst_104 [1] : vector<1x128xf32> to vector<1xf32>
    %255 = vector.shape_cast %254 : vector<1xf32> to vector<1x1xf32>
    %256 = arith.addf %228, %255 : vector<1x1xf32>
    %cst_105 = arith.constant 5.000000e-01 : f32
    %257 = vector.broadcast %cst_105 : f32 to vector<1x1xf32>
    %258 = arith.mulf %148, %257 : vector<1x1xf32>
    %259 = arith.divf %258, %63 : vector<1x1xf32>
    %260 = arith.divf %253, %256 : vector<1x1xf32>
    %261 = vector.shape_cast %259 : vector<1x1xf32> to vector<1x1xf32>
    %262 = vector.broadcast %261 : vector<1x1xf32> to vector<1x128xf32>
    %263 = vector.shape_cast %260 : vector<1x1xf32> to vector<1x1xf32>
    %264 = vector.broadcast %263 : vector<1x1xf32> to vector<1x128xf32>
    %265 = vector.shape_cast %63 : vector<1x1xf32> to vector<1x1xf32>
    %266 = vector.broadcast %265 : vector<1x1xf32> to vector<1x128xf32>
    %267 = vector.shape_cast %256 : vector<1x1xf32> to vector<1x1xf32>
    %268 = vector.broadcast %267 : vector<1x1xf32> to vector<1x128xf32>
    %269 = tpu.concatenate %262, %264, %266, %268, %42, %59 in 0 : vector<1x128xf32>, vector<1x128xf32>, vector<1x128xf32>, vector<1x128xf32>, vector<2x128xf32>, vector<2x128xf32> -> vector<8x128xf32>
    %c0_106 = arith.constant 0 : index
    %c0_107 = arith.constant 0 : index
    %270 = vector.load %arg4[%c0_106, %c0_107] : memref<8x128xf32, #tpu.memory_space<vmem>>, vector<8x128xf32>
    tpu.vector_store %arg4[%c0_106, %c0_107], %269 {strides = array<i32>} : memref<8x128xf32, #tpu.memory_space<vmem>>, vector<8x128xf32>,
    return
  }
}

</mosaic_0001>

<bundles_post_ra>
// kernel: cuboid_loss_forward.2
= control target key start
LH: loop header
LB: loop body
LE: loop exit
PB: predicated region body
PF: predicated region fallthrough
CT: control target
= control target key end

     0   :  { %9 = vsyncpa [#allocation3], 0  ;;  %s831_s18 = smov [#allocation2]   ;;  %s1146_s0 = inlined_call_operand.vmem [shape: s32[2], index: 0, kind: input, shape index: {}]   ;;  %s1147_s1 = inlined_call_operand.vmem [shape: f32[19,4,128], index: 1, kind: input, shape index: {}]   ;;  %s1148_s2 = inlined_call_operand.vmem [shape: f32[4,4,128], index: 2, kind: input, shape index: {}]   ;;  %s1149_s3 = inlined_call_operand.vmem [shape: f32[2,128,8], index: 3, kind: input, shape index: {}]   ;;  %s1150_s4 = inlined_call_operand.vmem [shape: f32[8,128], index: 4, kind: output, shape index: {}]  }
   0x1   :  { %s15_s17 = sshll.u32 %s1146_s0, 4  ;;  %s16_s17 = int_to_ptr.vmem [resolvable:$true] %s15_s17 }
   0x2   :  { %18 = dma.vmem_to_smem %s16_s17, 16, %s831_s18, [#allocation3]  }
   0x3   :  { %829 = dma.done.wait [#allocation3], 16  }
   0x4   :  { %830 = vsyncadd [#allocation3], 4294967280 }
   0x5   :  { %29 = sfence }
   0x6   :  { %v693_v0 = vld [vmem:[%s1147_s1 + $0x8] sm:$0xf]  ;;  %v694_v1 = vld [vmem:[%s1147_s1 + $0x18] sm:$0xf]  ;;  %v45_v2 = vld [vmem:[%s1147_s1] sm:$0xf]  ;;  %v93_v37 = vlaneseq }
   0x7   :  { %v44_v3 = vmin.f32 %v693_v0, %v694_v1  ;;  %v695_v4 = vld [vmem:[%s1147_s1 + $0x10] sm:$0xf]  ;;  %v696_v5 = vld [vmem:[%s1147_s1 + $0xc] sm:$0xf]  ;;  %v697_v6 = vld [vmem:[%s1147_s1 + $0x1c] sm:$0xf] }
   0x8   :  { %v48_v7 = vmax.f32 %v45_v2, %v695_v4  ;;  %v54_v8 = vmin.f32 %v696_v5, %v697_v6  ;;  %v698_v9 = vld [vmem:[%s1147_s1 + $0x4] sm:$0xf]  ;;  %v699_v10 = vld [vmem:[%s1147_s1 + $0x14] sm:$0xf]  ;;  %v700_v16 = vld [vmem:[%s1147_s1 + $0x20] sm:$0xf] }
   0x9   :  { %v59_v11 = vmax.f32 %v698_v9, %v699_v10  ;;  %vm1151_vm5 = vcmask 1041408   ;;  %v896_v38 = vand.u32 127, %v93_v37  ;;  %v30_v43 = vld [vmem:[%s1149_s3] sm:$0xff]  ;;  %v692_v44 = vld [vmem:[%s1149_s3 + $0x8] sm:$0xff]  ;;  %s219_s14 = sld [smem:[#allocation2]]  ;;  %v200_v1 = vshrl.u32 %v93_v37, 7 }
   0xa   :  { %v49_v12 = vsub.f32 %v44_v3, %v48_v7  ;;  %v202_v45 = vrot.slane %v30_v43, 4  ;;  %v233_v46 = vrot.slane %v692_v44, 4  ;;  %s719_s3 = sld [smem:[#allocation2 + $0x1]]  ;;  %v832_v6 = vmov 0  }
   0xb   :  { %v60_v13 = vsub.f32 %v54_v8, %v59_v11  ;;  %v95_v39 = vcvt.s32.f32 %v896_v38  ;;  %793 = vset.pattern.permute.xlu2 %v832_v6  ;;  %vm1152_vm12 = vcmask 1040384  }
   0xc   :  { %v61_v14 = vmax.f32 %v49_v12, 0.0  ;;  %v203_v47 = vmax.f32 %v30_v43, %v202_v45  ;;  %v234_v48 = vmax.f32 %v692_v44, %v233_v46 }
   0xd   :  { %v62_v15 = vmax.f32 %v60_v13, 0.0 }
   0xe   :  { %v204_v49 = vrot.slane %v203_v47, 2  ;;  %v235_v50 = vrot.slane %v234_v48, 2 }
   0xf   :  { %v63_v17 = vmul.f32 %v62_v15, %v61_v14  ;;  %v220_v2 = vstv %s219_s14 }
  0x10   :  { %v205_v51 = vmax.f32 %v203_v47, %v204_v49  ;;  %v236_v52 = vmax.f32 %v234_v48, %v235_v50  ;;  %v251_v3 = vstv %s719_s3  ;;  %vm221_vm7 = vcmp.eq.s32.totalorder %v200_v1, %v220_v2 }
  0x11   :  { %v66_v18 = vsub.f32 %v700_v16, %v63_v17  ;;  %v83_v27 = vrot.slane %v63_v17, 2  ;;  %vm252_vm8 = vcmp.eq.s32.totalorder %v200_v1, %v251_v3 }
  0x12   :  { %v206_v53 = vrot.slane %v205_v51, 1  ;;  %v237_v54 = vrot.slane %v236_v52, 1 }
  0x13   :  { %803 = vrcp.f32 %v66_v18  ;;  %v78_v21 = vand.u32 2147483648, %v66_v18  ;;  %vm72_vm0 = vweird.f32 %v66_v18  ;;  %v76_v23 = vand.u32 2147483647, %v66_v18 }
  0x14   :  { %v85_v31 = vadd.f32 %v83_v27, %v63_v17  ;;  %v207_v55 = vmax.f32 %v205_v51, %v206_v53  ;;  %v238_v56 = vmax.f32 %v236_v52, %v237_v54  ;;  %v834_v52 = vmov 0.0  }
  0x15   :  { %v79_v25 = vor.u32 1.1754944e-38, %v78_v21  ;;  %vm77_vm3 = vcmp.eq.f32.partialorder %v76_v23, 8.507059e+37 }
  0x16   :  { %vm90_vm4 = vcmp.gt.f32.partialorder %v85_v31, 0.0  ;;  %v208_v57 = vsub.f32 %v30_v43, %v207_v55  ;;  %v239_v58 = vsub.f32 %v692_v44, %v238_v56  ;;  %v833_v44 = vmov 1  }
  0x17   :  { %792 = vset.pattern.permute.xlu0 %v833_v44 }
  0x18   :  { %v209_v59 = vmul.f32 1.442695, %v208_v57  ;;  %v240_v60 = vmul.f32 1.442695, %v239_v58  ;;  %v222_v9 = vsel %vm221_vm7, %v208_v57, 0.0  ;;  %v253_v10 = vsel %vm252_vm8, %v239_v58, 0.0 }
  0x19   :  { %v804_v19 = vpop.eup %803  ;;  %v223_v12 = vrot.slane %v222_v9, 4  ;;  %v254_v13 = vrot.slane %v253_v10, 4  ;;  %v261_v31 = vrot.slane %v239_v58, 7 }
  0x1a   :  { %v68_v20 = vmul.f32 %v804_v19, %v66_v18  ;;  %vm73_vm1 = vweird.f32 %v804_v19  ;;  %805 = vpow2.f32 %v209_v59 }
  0x1b   :  { %vm74_vm2 = vmor %vm72_vm0, %vm73_vm1  ;;  %807 = vpow2.f32 %v240_v60  ;;  %v224_v16 = vadd.f32 %v223_v12, %v222_v9 }
  0x1c   :  { %v69_v22 = vsub.f32 1.0, %v68_v20 }
  0x1d   :  { %v225_v20 = vrot.slane %v224_v16, 2 }
  0x1e   :  { %v70_v24 = vmul.f32 %v804_v19, %v69_v22 }
  0x1f   :  { %v226_v23 = vadd.f32 %v225_v20, %v224_v16 }
  0x20   :  { %v71_v26 = vadd.f32 %v804_v19, %v70_v24  ;;  %v806_v61 = vpop.eup %805 }
  0x21   :  { %v808_v62 = vpop.eup %807  ;;  %v211_v63 = vrot.slane %v806_v61, 4 }
  0x22   :  { %v75_v28 = vsel %vm74_vm2, %v804_v19, %v71_v26  ;;  %v242_v0 = vrot.slane %v808_v62, 4 }
  0x23   :  { %v80_v29 = vsel %vm77_vm3, %v79_v25, %v75_v28  ;;  %v212_v4 = vadd.f32 %v806_v61, %v211_v63  ;;  %v227_v25 = vrot.slane %v226_v23, 1 }
  0x24   :  { %v81_v30 = vmul.f32 %v80_v29, %v63_v17  ;;  %v243_v5 = vadd.f32 %v808_v62, %v242_v0  ;;  %v255_v17 = vadd.f32 %v254_v13, %v253_v10 }
  0x25   :  { %v213_v7 = vrot.slane %v212_v4, 2  ;;  %v228_v29 = vadd.f32 %v227_v25, %v226_v23 }
  0x26   :  { %v87_v32 = vrot.slane %v81_v30, 2  ;;  %v244_v8 = vrot.slane %v243_v5, 2  ;;  %v256_v21 = vrot.slane %v255_v17, 2 }
  0x27   :  { %v214_v11 = vadd.f32 %v213_v7, %v212_v4 }
  0x28   :  { %v89_v33 = vadd.f32 %v87_v32, %v81_v30  ;;  %v245_v14 = vadd.f32 %v244_v8, %v243_v5  ;;  %v257_v24 = vadd.f32 %v256_v21, %v255_v17 }
  0x29   :  { %v215_v15 = vrot.slane %v214_v11, 1 }
  0x2a   :  { %v91_v34 = vmul.f32 0.5, %v89_v33  ;;  %v246_v18 = vrot.slane %v245_v14, 1  ;;  %v258_v26 = vrot.slane %v257_v24, 1 }
  0x2b   :  { %v216_v19 = vadd.f32 %v215_v15, %v214_v11 }
  0x2c   :  { %v892_v35 = vsel %vm90_vm4, %v91_v34, 0.0  ;;  %v247_v22 = vadd.f32 %v246_v18, %v245_v14  ;;  %v259_v30 = vadd.f32 %v258_v26, %v257_v24 }
  0x2d   :  { %v97_v36 = vsel %vm1151_vm5, %v892_v35, -inf  ;;  %809 = vlog2.f32 %v216_v19  ;;  %vm105_vm9 = vcmp.ge.f32.partialorder %v892_v35, 0.5 }
  0x2e   :  { %98 = vmax.xlane.f32.xlu0 %v97_v36  ;;  %811 = vlog2.f32 %v247_v22 }
  0x33   :  { %v810_v27 = vpop.eup %809 }
  0x34   :  { %v812_v28 = vpop.eup %811  ;;  %v218_v33 = vmul.f32 0.6931472, %v810_v27  ;;  %v835_v27 = vmov 1.0  }
  0x35   :  { %v249_v34 = vmul.f32 0.6931472, %v812_v28 }
  0xa1   :  { %v99_v40 = vpop.xlane.xlu0 %98 }
  0xa2   :  { %vm100_vm6 = vcmp.eq.f32.partialorder %v892_v35, %v99_v40 }
  0xa3   :  { %v101_v41 = vsel %vm100_vm6, %v95_v39, 128.0 }
  0xa4   :  { %v102_v42 = vsel %vm1151_vm5, %v101_v41, inf }
  0xa5   :  { %103 = vmin.xlane.f32.xlu0 %v102_v42 }
 0x118   :  { %v104_v32 = vpop.xlane.xlu0 %103 }
 0x119   :  { %vm106_vm10 = vcmp.eq.f32.partialorder %v95_v39, %v104_v32 }
 0x11a   :  { %vm913_vm11 = vmor %vm105_vm9, %vm106_vm10 }
 0x11b   :  { %v229_v37 = vsel %vm913_vm11, %v228_v29, %v208_v57  ;;  %v263_v40 = vsel %vm913_vm11, %v259_v30, %v261_v31  ;;  %v943_v53 = vsel %vm913_vm11, 1.0, %v834_v52 }
 0x11c   :  { %v230_v41 = vsub.f32 %v218_v33, %v229_v37  ;;  %v264_v42 = vsub.f32 %v249_v34, %v263_v40  ;;  %v110_v54 = vsel %vm1151_vm5, %v943_v53, 0.0  ;;  %v702_v40 = vld [vmem:[%s1147_s1 + $0x3c] sm:$0xf] }
 0x11e   :  { %v922_v43 = vsel %vm1152_vm12, %v230_v41, %v264_v42  ;;  %v703_v41 = vld [vmem:[%s1147_s1 + $0x24] sm:$0xf]  ;;  %v705_v42 = vld [vmem:[%s1147_s1 + $0x40] sm:$0xf] }
 0x11f   :  { %v267_v38 = vsel %vm913_vm11, -1e+30, %v922_v43 }
 0x120   :  { %v268_v39 = vsel %vm1151_vm5, %v267_v38, -1e+30  ;;  %v953_v62 = vperm.slane %v267_v38, 0  ;;  %v955_v63 = vperm.slane %v267_v38, 1  ;;  %v706_v38 = vld [vmem:[%s1147_s1 + $0x28] sm:$0xf] }
 0x121   :  { %269 = vxpose.xlu1.b32.start.end [1/1] (short) %v268_v39, 128  ;;  %v124_v39 = vsub.f32 %v702_v40, %v703_v41 }
 0x1c5   :  { %v929_v45 = vpop.trf.xlu1 }
 0x1cd   :  { %v286_v46 = vpop.trf.xlu1 }
 0x1d5   :  { %v931_v47 = vpop.trf.xlu1 }
 0x1d6   :  { %475 = vperm.xlu0 %792, %v931_v47  }
 0x1dd   :  { %v934_v48 = vpop.trf.xlu1 }
 0x1de   :  { %479 = vperm.xlu0 %792, %v934_v48  }
 0x1e5   :  { %v937_v49 = vpop.trf.xlu1 }
 0x1e6   :  { %483 = vperm.xlu0 %792, %v937_v49  }
 0x1ed   :  { %v290_v50 = vpop.trf.xlu1 }
 0x1ee   :  { %328 = vperm.xlu2 %793, %v290_v50   ;;  %487 = vperm.xlu0 %792, %v290_v50   ;;  %v709_v50 = vld [vmem:[%s1147_s1 + $0x34] sm:$0xf] }
 0x1f5   :  { %v291_v51 = vpop.trf.xlu1 }
 0x1f6   :  { %333 = vperm.xlu2 %793, %v291_v51   ;;  %491 = vperm.xlu0 %792, %v291_v51   ;;  %v146_v51 = vld [vmem:[%s1148_s2] sm:$0xf] }
 0x1f9   :  { %111 = vadd.xlane.f32.xlu1 %v110_v54  ;;  %v713_v54 = vld [vmem:[%s1148_s2 + $0x4] sm:$0xf] }
 0x1fd   :  { %v292_v55 = vpop.trf.xlu1 }
 0x1fe   :  { %338 = vperm.xlu2 %793, %v292_v55   ;;  %495 = vperm.xlu0 %792, %v292_v55  }
 0x205   :  { %v293_v56 = vpop.trf.xlu1 }
 0x206   :  { %343 = vperm.xlu2 %793, %v293_v56   ;;  %499 = vperm.xlu0 %792, %v293_v56  }
 0x20d   :  { %v294_v57 = vpop.trf.xlu1 }
 0x20e   :  { %348 = vperm.xlu2 %793, %v294_v57   ;;  %503 = vperm.xlu0 %792, %v294_v57  }
 0x215   :  { %v295_v58 = vpop.trf.xlu1 }
 0x216   :  { %353 = vperm.xlu2 %793, %v295_v58   ;;  %507 = vperm.xlu0 %792, %v295_v58   ;;  %v715_v58 = vld [vmem:[%s1148_s2 + $0x8] sm:$0xf] }
 0x21d   :  { %v296_v59 = vpop.trf.xlu1 }
 0x21e   :  { %794 = vset.pattern.permute.xlu2 %v833_v44 }
 0x21f   :  { %511 = vperm.xlu2 %794, %v296_v59  }
 0x225   :  { %v297_v60 = vpop.trf.xlu1 }
 0x227   :  { %795 = vset.pattern.permute.xlu2 %v832_v6 }
 0x228   :  { %358 = vperm.xlu2 %795, %v296_v59   ;;  %v710_v59 = vld [vmem:[%s1147_s1 + $0x48] sm:$0xf] }
 0x22d   :  { %v298_v61 = vpop.trf.xlu1 }
 0x22e   :  { %519 = vperm.xlu0 %792, %v298_v61  }
 0x230   :  { %796 = vset.pattern.permute.xlu2 %v833_v44 }
 0x231   :  { %515 = vperm.xlu2 %796, %v297_v60  }
 0x235   :  { %v299_v0 = vpop.trf.xlu1 }
 0x236   :  { %471 = vperm.xlu0 %792, %v286_v46  }
 0x239   :  { %797 = vset.pattern.permute.xlu2 %v832_v6 }
 0x23a   :  { %363 = vperm.xlu2 %797, %v297_v60   ;;  %v711_v60 = vld [vmem:[%s1147_s1 + $0x38] sm:$0xf] }
 0x23d   :  { %v300_v8 = vpop.trf.xlu1 }
 0x23e   :  { %467 = vperm.xlu0 %792, %v929_v45  }
 0x242   :  { %368 = vperm.xlu2 %797, %v298_v61  }
 0x246   :  { %802 = vset.pattern.permute.xlu0 %v832_v6 }
 0x247   :  { %308 = vperm.xlu0 %802, %v286_v46   ;;  %v707_v46 = vld [vmem:[%s1147_s1 + $0x30] sm:$0xf] }
 0x248   :  { %v957_v1 = vpop.permute.xlu0 %475  ;;  %v959_v2 = vpop.permute.xlu2 %328 }
 0x24a   :  { %798 = vset.pattern.permute.xlu2 %v833_v44 }
 0x24b   :  { %523 = vperm.xlu2 %798, %v299_v0  }
 0x250   :  { %v966_v3 = vpop.permute.xlu0 %479  ;;  %v968_v4 = vpop.permute.xlu2 %333 }
 0x251   :  { %vm534_vm15 = vcmp.gt.f32.partialorder %v966_v3, %v955_v63  ;;  %v717_v3 = vld [vmem:[%s1148_s2 + $0xc] sm:$0xf] }
 0x253   :  { %799 = vset.pattern.permute.xlu2 %v832_v6 }
 0x254   :  { %373 = vperm.xlu2 %799, %v299_v0   ;;  %v145_v0 = vsub.f32 %v710_v59, %v711_v60 }
 0x258   :  { %v975_v5 = vpop.permute.xlu0 %483  ;;  %v977_v7 = vpop.permute.xlu2 %338 }
 0x259   :  { %vm535_vm1 = vcmp.gt.f32.partialorder %v975_v5, %v955_v63 }
 0x25c   :  { %800 = vset.pattern.permute.xlu2 %v833_v44  ;;  %v704_v44 = vld [vmem:[%s1147_s1 + $0x2c] sm:$0xf] }
 0x25d   :  { %527 = vperm.xlu2 %800, %v300_v8  }
 0x260   :  { %v984_v9 = vpop.permute.xlu0 %487  ;;  %v986_v10 = vpop.permute.xlu2 %343 }
 0x261   :  { %vm536_vm3 = vcmp.gt.f32.partialorder %v984_v9, %v955_v63  ;;  %vm390_vm4 = vcmp.gt.f32.partialorder %v986_v10, %v953_v62 }
 0x265   :  { %801 = vset.pattern.permute.xlu2 %v832_v6 }
 0x266   :  { %378 = vperm.xlu2 %801, %v300_v8  }
 0x268   :  { %v349_v11 = vpop.permute.xlu2 %348  ;;  %v492_v15 = vpop.permute.xlu0 %491 }
 0x269   :  { %vm391_vm6 = vcmp.gt.f32.partialorder %v349_v11, %v953_v62 }
 0x26c   :  { %v1101_v5 = vpop.xlane.xlu1 %111 }
 0x26e   :  { %323 = vperm.xlu2 %801, %v937_v49   ;;  %v708_v49 = vld [vmem:[%s1147_s1 + $0x44] sm:$0xf] }
 0x26f   :  { %v140_v55 = vsub.f32 %v708_v49, %v709_v50 }
 0x270   :  { %v354_v12 = vpop.permute.xlu2 %353  ;;  %v496_v17 = vpop.permute.xlu0 %495 }
 0x271   :  { %vm392_vm7 = vcmp.gt.f32.partialorder %v354_v12, %v953_v62  ;;  %vm538_vm2 = vcmp.gt.f32.partialorder %v496_v17, %v955_v63 }
 0x276   :  { %318 = vperm.xlu2 %801, %v934_v48  }
 0x278   :  { %v500_v20 = vpop.permute.xlu0 %499 }
 0x279   :  { %v512_v13 = vpop.permute.xlu2 %511 }
 0x27a   :  { %vm542_vm8 = vcmp.gt.f32.partialorder %v512_v13, %v955_v63 }
 0x27e   :  { %313 = vperm.xlu2 %801, %v931_v47   ;;  %v127_v47 = vmul.f32 %v704_v44, %v124_v39 }
 0x280   :  { %v504_v22 = vpop.permute.xlu0 %503  ;;  %v147_v56 = vsub.f32 %v146_v51, %v127_v47 }
 0x282   :  { %v359_v14 = vpop.permute.xlu2 %358  ;;  %v148_v61 = vand.u32 2147483647, %v147_v56 }
 0x283   :  { %vm393_vm9 = vcmp.gt.f32.partialorder %v359_v14, %v953_v62  ;;  %v176_v14 = vsub.f32 %v717_v3, %v145_v0 }
 0x284   :  { %v712_v8 = vadd.f32 -0.5, %v148_v61 }
 0x286   :  { %303 = vperm.xlu2 %801, %v929_v45   ;;  %v132_v45 = vsub.f32 %v705_v42, %v706_v38 }
 0x288   :  { %v508_v24 = vpop.permute.xlu0 %507  ;;  %v135_v48 = vmul.f32 %v707_v46, %v132_v45 }
 0x289   :  { %vm541_vm13 = vcmp.gt.f32.partialorder %v508_v24, %v955_v63  ;;  %v179_v24 = vmul.f32 0.5, %v176_v14 }
 0x28a   :  { %v156_v57 = vsub.f32 %v713_v54, %v135_v48 }
 0x28b   :  { %v516_v16 = vpop.permute.xlu2 %515 }
 0x28c   :  { %vm543_vm14 = vcmp.gt.f32.partialorder %v516_v16, %v955_v63  ;;  %v450_v16 = vmul.f32 3.0, %v1101_v5 }
 0x294   :  { %v364_v18 = vpop.permute.xlu2 %363 }
 0x29c   :  { %v369_v19 = vpop.permute.xlu2 %368 }
 0x2a0   :  { %v520_v26 = vpop.permute.xlu0 %519 }
 0x2a1   :  { %vm544_vm12 = vcmp.gt.f32.partialorder %v520_v26, %v955_v63 }
 0x2a5   :  { %v524_v21 = vpop.permute.xlu2 %523 }
 0x2a6   :  { %vm545_vm5 = vcmp.gt.f32.partialorder %v524_v21, %v955_v63 }
 0x2a8   :  { %v472_v29 = vpop.permute.xlu0 %471 }
 0x2ae   :  { %v374_v23 = vpop.permute.xlu2 %373 }
 0x2b0   :  { %v468_v31 = vpop.permute.xlu0 %467 }
 0x2b7   :  { %v528_v25 = vpop.permute.xlu2 %527 }
 0x2b8   :  { %vm546_vm10 = vcmp.gt.f32.partialorder %v528_v25, %v955_v63  ;;  %v600_v25 = vrot.slane %v450_v16, 1 }
 0x2b9   :  { %769 = vmatpush.msk.msra.mxu1 %vm546_vm10, %v835_v27  ;;  %vm396_vm10 = vcmp.gt.f32.partialorder %v374_v23, %v953_v62  ;;  %v309_v34 = vpop.permute.xlu0 %308  ;;  %v177_v23 = vand.u32 2147483647, %v176_v14 }
 0x2bb   :  { %770 = vmatpush.msk.msra.mxu1 %vm545_vm5, %v835_v27  ;;  %vm540_vm5 = vcmp.gt.f32.partialorder %v504_v22, %v955_v63 }
 0x2bd   :  { %771 = vmatpush.msk.msra.mxu1 %vm544_vm12, %v835_v27  ;;  %vm395_vm12 = vcmp.gt.f32.partialorder %v369_v19, %v953_v62 }
 0x2bf   :  { %772 = vmatpush.msk.msra.mxu1 %vm543_vm14, %v835_v27  ;;  %vm539_vm14 = vcmp.gt.f32.partialorder %v500_v20, %v955_v63 }
 0x2c0   :  { %v379_v28 = vpop.permute.xlu2 %378 }
 0x2c1   :  { %773 = vmatpush.msk.msra.mxu1 %vm542_vm8, %v835_v27  ;;  %vm397_vm0 = vcmp.gt.f32.partialorder %v379_v28, %v953_v62  ;;  %vm394_vm8 = vcmp.gt.f32.partialorder %v364_v18, %v953_v62 }
 0x2c2   :  { %736 = vmatpush.msk.msra.mxu0 %vm397_vm0, %v835_v27  ;;  %vm1155_vm0 = vcmp.gt.f32.partialorder %v977_v7, %v953_v62 }
 0x2c3   :  { %774 = vmatpush.msk.msra.mxu1 %vm541_vm13, %v835_v27  ;;  %vm537_vm13 = vcmp.gt.f32.partialorder %v492_v15, %v955_v63 }
 0x2c4   :  { %737 = vmatpush.msk.msra.mxu0 %vm396_vm10, %v835_v27  ;;  %vm383_vm10 = vcmp.gt.f32.partialorder %v309_v34, %v953_v62 }
 0x2c5   :  { %775 = vmatpush.msk.msra.mxu1 %vm540_vm5, %v835_v27 }
 0x2c6   :  { %738 = vmatpush.msk.msra.mxu0 %vm395_vm12, %v835_v27  ;;  %vm836_vm12 = vmmov 1  }
 0x2c7   :  { %776 = vmatpush.msk.msra.mxu1 %vm539_vm14, %v835_v27  ;;  %vm1097_vm14 = vmxor %vm913_vm11, %vm836_vm12  ;;  %vm1165_vm12 = vcmask 1040384  }
 0x2c8   :  { %739 = vmatpush.msk.msra.mxu0 %vm394_vm8, %v835_v27  ;;  %v324_v30 = vpop.permute.xlu2 %323  ;;  %vm1103_vm8 = vcmp.lt.f32.partialorder %v148_v61, 1.0  ;;  %v603_v15 = vsel %vm1097_vm14, 1, %v832_v6 }
 0x2c9   :  { %777 = vmatpush.msk.msra.mxu1 %vm538_vm2, %v835_v27  ;;  %vm1156_vm2 = vcmp.gt.f32.partialorder %v957_v1, %v955_v63  ;;  %v157_v1 = vand.u32 2147483647, %v156_v57  ;;  %v604_v21 = vrot.slane %v603_v15, 1 }
 0x2ca   :  { %740 = vmatpush.msk.msra.mxu0 %vm393_vm9, %v835_v27 }
 0x2cb   :  { %778 = vmatpush.msk.msra.mxu1 %vm537_vm13, %v835_v27  ;;  %v714_v13 = vadd.f32 -0.5, %v157_v1  ;;  %vm158_vm13 = vcmp.lt.f32.partialorder %v157_v1, 1.0 }
 0x2cc   :  { %741 = vmatpush.msk.msra.mxu0 %vm392_vm7, %v835_v27 }
 0x2cd   :  { %779 = vmatpush.msk.msra.mxu1 %vm536_vm3, %v835_v27  ;;  %vm1157_vm3 = vcmp.gt.f32.partialorder %v968_v4, %v953_v62 }
 0x2ce   :  { %742 = vmatpush.msk.msra.mxu0 %vm391_vm6, %v835_v27  ;;  %vm386_vm6 = vcmp.gt.f32.partialorder %v324_v30, %v953_v62  ;;  %v718_v30 = vadd.f32 -0.5, %v177_v23 }
 0x2cf   :  { %780 = vmatpush.msk.msra.mxu1 %vm535_vm1, %v835_v27  ;;  %vm532_vm1 = vcmp.gt.f32.partialorder %v472_v29, %v955_v63  ;;  %v180_v29 = vmul.f32 %v179_v24, %v176_v14 }
 0x2d0   :  { %743 = vmatpush.msk.msra.mxu0 %vm390_vm4, %v835_v27  ;;  %v319_v32 = vpop.permute.xlu2 %318  ;;  %vm531_vm4 = vcmp.gt.f32.partialorder %v468_v31, %v955_v63  ;;  %v166_v63 = vsub.f32 %v715_v58, %v140_v55 }
 0x2d1   :  { %781 = vmatpush.msk.msra.mxu1 %vm534_vm15, %v835_v27  ;;  %vm1158_vm15 = vcmp.gt.f32.partialorder %v959_v2, %v953_v62  ;;  %vm385_vm7 = vcmp.gt.f32.partialorder %v319_v32, %v953_v62  ;;  %v159_v2 = vmul.f32 0.5, %v156_v57 }
 0x2d2   :  { %744 = vmatpush.msk.msra.mxu0 %vm1155_vm0, %v835_v27  ;;  %v167_v9 = vand.u32 2147483647, %v166_v63  ;;  %v169_v10 = vmul.f32 0.5, %v166_v63 }
 0x2d3   :  { %782 = vmatpush.msk.msra.mxu1 %vm1156_vm2, %v835_v27  ;;  %v160_v12 = vmul.f32 %v159_v2, %v156_v57 }
 0x2d4   :  { %745 = vmatpush.msk.msra.mxu0 %vm1157_vm3, %v835_v27  ;;  %vm1113_vm0 = vcmp.lt.f32.partialorder %v167_v9, 1.0  ;;  %v170_v19 = vmul.f32 %v169_v10, %v166_v63  ;;  %v716_v20 = vadd.f32 -0.5, %v167_v9 }
 0x2d5   :  { %783 = vmatpush.msk.msra.mxu1 %vm532_vm1, %v835_v27  ;;  %v162_v22 = vsel %vm158_vm13, %v160_v12, %v714_v13  ;;  %vm605_vm1 = vcmp.ne.s32.totalorder %v604_v21, 0 }
 0x2d6   :  { %746 = vmatpush.msk.msra.mxu0 %vm1158_vm15, %v835_v27  ;;  %v172_v28 = vsel %vm1113_vm0, %v170_v19, %v716_v20 }
 0x2d7   :  { %784 = vmatpush.msk.msra.mxu1 %vm531_vm4, %v835_v27  ;;  %vm178_vm4 = vcmp.lt.f32.partialorder %v177_v23, 1.0 }
 0x2d8   :  { %747 = vmatpush.msk.msra.mxu0 %vm386_vm6, %v835_v27  ;;  %595 = vmatmul.f32.vlgmr.msra.gmra.mxu1 %v835_v27  ;;  %v314_v33 = vpop.permute.xlu2 %313  ;;  %v182_v34 = vsel %vm178_vm4, %v180_v29, %v718_v30  ;;  %vm614_vm6 = vcmask 1041409  }
 0x2d9   :  { %vm384_vm9 = vcmp.gt.f32.partialorder %v314_v33, %v953_v62 }
 0x2da   :  { %748 = vmatpush.msk.msra.mxu0 %vm385_vm7, %v835_v27 }
 0x2dc   :  { %749 = vmatpush.msk.msra.mxu0 %vm384_vm9, %v835_v27 }
 0x2de   :  { %750 = vmatpush.msk.msra.mxu0 %vm383_vm10, %v835_v27 }
 0x2e0   :  { %v304_v37 = vpop.permute.xlu2 %303 }
 0x2e1   :  { %vm382_vm5 = vcmp.gt.f32.partialorder %v304_v37, %v953_v62  ;;  %v150_v62 = vmul.f32 0.5, %v147_v56 }
 0x2e2   :  { %751 = vmatpush.msk.msra.mxu0 %vm382_vm5, %v835_v27 }
 0x2e3   :  { %446 = vmatmul.f32.vlgmr.msra.gmra.mxu0 %v835_v27  ;;  %v151_v7 = vmul.f32 %v150_v62, %v147_v56 }
 0x2e5   :  { %v153_v17 = vsel %vm1103_vm8, %v151_v7, %v712_v8  ;;  %vm1166_vm8 = vcmask 1041408  }
 0x2e6   :  { %v163_v27 = vadd.f32 %v162_v22, %v153_v17 }
 0x2e8   :  { %v173_v33 = vadd.f32 %v172_v28, %v163_v27 }
 0x2ea   :  { %v183_v40 = vadd.f32 %v182_v34, %v173_v33 }
 0x2ec   :  { %v185_v38 = vrot.slane %v183_v40, 2 }
 0x2ee   :  { %v187_v45 = vadd.f32 %v185_v38, %v183_v40  ;;  %v673_v40 = vrot.slane %v892_v35, 4 }
 0x2f0   :  { %v188_v47 = vmul.f32 %v943_v53, %v187_v45 }
 0x2f2   :  { %v189_v49 = vsel %vm1166_vm8, %v188_v47, 0.0 }
 0x355   :  { %v596_v26 = vpop.f32.mrf.mxu1 }
 0x356   :  { %vm602_vm2 = vcmp.lt.f32.partialorder %v596_v26, %v600_v25 }
 0x357   :  { %vm606_vm3 = vmand %vm602_vm2, %vm605_vm1 }
 0x358   :  { %v607_v31 = vsel %vm606_vm3, 1, %v832_v6  ;;  %vm1168_vm1 = vmmov %vm1166_vm8 }
 0x359   :  { %v608_v32 = vrot.slane %v607_v31, 7  ;;  %v113_v7 = vsel %vm1168_vm1, %v1101_v5, 0.0  ;;  %vm1169_vm3 = vmmov %vm1168_vm1 }
 0x35a   :  { %v114_v8 = vrot.slane %v113_v7, 4  ;;  %vm1171_vm8 = vmmov %vm1168_vm1 }
 0x35b   :  { %vm609_vm15 = vcmp.ne.s32.totalorder %v608_v32, 0 }
 0x35c   :  { %vm610_vm7 = vmor %vm913_vm11, %vm609_vm15  ;;  %v115_v9 = vadd.f32 %v114_v8, %v113_v7 }
 0x35d   :  { %v785_v37 = vsel %vm610_vm7, 1.0, %v834_v52 }
 0x35e   :  { %v622_v41 = vsel %vm614_vm6, %v785_v37, 0.0  ;;  %v613_v6 = vmul.f32 %v785_v37, %v922_v43  ;;  %v116_v10 = vrot.slane %v115_v9, 2 }
 0x35f   :  { %623 = vadd.xlane.f32.xlu2 %v622_v41 }
 0x360   :  { %v447_v42 = vpop.f32.mrf.mxu0  ;;  %v615_v46 = vsel %vm614_vm6, %v613_v6, 0.0  ;;  %v117_v11 = vadd.f32 %v116_v10, %v115_v9  ;;  %v676_v6 = vrot.slane %v943_v53, 2 }
 0x361   :  { %vm451_vm9 = vcmp.lt.f32.partialorder %v447_v42, %v450_v16 }
 0x362   :  { %vm453_vm10 = vmand %vm451_vm9, %vm1097_vm14  ;;  %v118_v12 = vrot.slane %v117_v11, 1 }
 0x363   :  { %vm454_vm5 = vmor %vm913_vm11, %vm453_vm10  ;;  %vm680_vm10 = vcmask 1042432  }
 0x364   :  { %v752_v39 = vsel %vm454_vm5, 1.0, %v834_v52  ;;  %vm1167_vm14 = vmmov %vm1165_vm12  ;;  %v119_v14 = vadd.f32 %v118_v12, %v117_v11  ;;  %vm682_vm5 = vcmask 1043456  }
 0x365   :  { %v462_v44 = vsel %vm1165_vm12, %v752_v39, 0.0  ;;  %v457_v48 = vmul.f32 %v752_v39, %v922_v43  ;;  %vm1170_vm9 = vmmov %vm1165_vm12  ;;  %vm684_vm12 = vcmask 1045504  }
 0x366   :  { %463 = vadd.xlane.f32.xlu0 %v462_v44  ;;  %v641_v26 = vand.u32 2147483648, %v119_v14  ;;  %vm635_vm15 = vweird.f32 %v119_v14  ;;  %v639_v27 = vand.u32 2147483647, %v119_v14 }
 0x367   :  { %616 = vadd.xlane.f32.xlu2 %v615_v46  ;;  %v458_v50 = vsel %vm1167_vm14, %v457_v48, 0.0 }
 0x368   :  { %v642_v30 = vor.u32 1.1754944e-38, %v641_v26  ;;  %vm640_vm7 = vcmp.eq.f32.partialorder %v639_v27, 8.507059e+37 }
 0x36e   :  { %190 = vadd.xlane.f32.xlu0 %v189_v49 }
 0x36f   :  { %459 = vadd.xlane.f32.xlu2 %v458_v50 }
 0x3d2   :  { %v624_v36 = vpop.xlane.xlu2 %623 }
 0x3d3   :  { %v626_v51 = vrot.slane %v624_v36, 1 }
 0x3d9   :  { %v464_v52 = vpop.xlane.xlu0 %463 }
 0x3da   :  { %v628_v54 = vadd.f32 %v626_v51, %v464_v52  ;;  %v617_v55 = vpop.xlane.xlu2 %616 }
 0x3db   :  { %v619_v62 = vrot.slane %v617_v55, 1 }
 0x3dc   :  { %813 = vrcp.f32 %v628_v54  ;;  %666 = vperm.xlu0 %802, %v628_v54   ;;  %v656_v59 = vand.u32 2147483648, %v628_v54  ;;  %v654_v43 = vand.u32 2147483647, %v628_v54  ;;  %vm650_vm13 = vweird.f32 %v628_v54 }
 0x3dd   :  { %815 = vrcp.f32 %v119_v14 }
 0x3de   :  { %v657_v0 = vor.u32 1.1754944e-38, %v656_v59  ;;  %vm655_vm2 = vcmp.eq.f32.partialorder %v654_v43, 8.507059e+37 }
 0x3e1   :  { %v191_v13 = vpop.xlane.xlu0 %190 }
 0x3e2   :  { %v814_v56 = vpop.eup %813  ;;  %v460_v61 = vpop.xlane.xlu2 %459  ;;  %v192_v15 = vsel %vm1169_vm3, %v191_v13, 0.0 }
 0x3e3   :  { %v646_v57 = vmul.f32 %v814_v56, %v628_v54  ;;  %vm651_vm11 = vweird.f32 %v814_v56  ;;  %v621_v2 = vadd.f32 %v619_v62, %v460_v61  ;;  %v193_v16 = vrot.slane %v192_v15, 4  ;;  %v816_v18 = vpop.eup %815 }
 0x3e4   :  { %vm652_vm0 = vmor %vm650_vm13, %vm651_vm11  ;;  %v631_v20 = vmul.f32 %v816_v18, %v119_v14  ;;  %vm636_vm4 = vweird.f32 %v816_v18 }
 0x3e5   :  { %v647_v58 = vsub.f32 1.0, %v646_v57  ;;  %v194_v17 = vadd.f32 %v193_v16, %v192_v15  ;;  %vm637_vm6 = vmor %vm635_vm15, %vm636_vm4 }
 0x3e6   :  { %v632_v22 = vsub.f32 1.0, %v631_v20 }
 0x3e7   :  { %v648_v60 = vmul.f32 %v814_v56, %v647_v58  ;;  %v195_v19 = vrot.slane %v194_v17, 2 }
 0x3e8   :  { %v633_v24 = vmul.f32 %v816_v18, %v632_v22 }
 0x3e9   :  { %v649_v63 = vadd.f32 %v814_v56, %v648_v60  ;;  %v196_v21 = vadd.f32 %v195_v19, %v194_v17 }
 0x3ea   :  { %v634_v25 = vadd.f32 %v816_v18, %v633_v24 }
 0x3eb   :  { %v653_v1 = vsel %vm652_vm0, %v814_v56, %v649_v63  ;;  %v197_v23 = vrot.slane %v196_v21, 1 }
 0x3ec   :  { %v658_v3 = vsel %vm655_vm2, %v657_v0, %v653_v1  ;;  %v638_v29 = vsel %vm637_vm6, %v816_v18, %v634_v25 }
 0x3ed   :  { %v659_v4 = vmul.f32 %v658_v3, %v621_v2  ;;  %v198_v5 = vadd.f32 %v197_v23, %v196_v21  ;;  %v643_v32 = vsel %vm640_vm7, %v642_v30, %v638_v29 }
 0x3ef   :  { %662 = vperm.xlu2 %801, %v659_v4   ;;  %v629_v28 = vmul.f32 0.5, %v198_v5 }
 0x3f1   :  { %v644_v34 = vmul.f32 %v643_v32, %v629_v28 }
 0x449   :  { %v663_v31 = vpop.permute.xlu2 %662 }
 0x44a   :  { %v668_v33 = vrot.slane %v663_v31, 7 }
 0x44c   :  { %v678_v37 = vsel %vm1170_vm9, %v644_v34, %v668_v33 }
 0x44d   :  { %v679_v38 = vsel %vm1171_vm8, %v678_v37, %v119_v14 }
 0x44e   :  { %v667_v41 = vpop.permute.xlu0 %666 }
 0x44f   :  { %v670_v42 = vrot.slane %v667_v41, 5 }
 0x451   :  { %v681_v39 = vsel %vm680_vm10, %v679_v38, %v670_v42 }
 0x452   :  { %v683_v44 = vsel %vm682_vm5, %v681_v39, %v673_v40 }
 0x453   :  { %v685_v45 = vsel %vm684_vm12, %v683_v44, %v676_v6 }
 0x454   :  { %686 = vst [vmem:[%s1150_s4] sm:$0xff] %v685_v45 }
 0x455   :  { %691 = vsyncpa [#allocation3], 1 }

</bundles_post_ra>
